<compile_context>
chip_gen: v5e
topology: v5e:2x2
jax: 0.10.0
libtpu: 0.0.40
codegen_flags: <defaults>
</compile_context>

<pallas_src>
import functools

import jax
import jax.numpy as jnp
import numpy as np
from jax.experimental import pallas as pl
from jax.experimental.pallas import tpu as pltpu

# ----------------------------------------------------------------------------
# Model hyper-parameters.
# ----------------------------------------------------------------------------
SERVICE_NUM = 16
USER_NUM = 24
USER_FC_FEATURE_SIZE = 8
SERVICE_FC_FEATURE_SIZE = 16
LSTM_HIDDEN_UNIT = 32
LSTM_LAYER_NUM = 1          # single GRU layer
TIME_WINDOW = 8
BATCH_SIZE = 8              # fills one f32 sublane group (was 2)

GRU_IN = 2 * (USER_FC_FEATURE_SIZE + SERVICE_FC_FEATURE_SIZE)   # 48
FEAT_IN = 2 * (SERVICE_NUM + USER_NUM)                          # 80
H = LSTM_HIDDEN_UNIT                                            # 32


# ----------------------------------------------------------------------------
# Pallas kernel: fully fused forward in a single invocation.
# ----------------------------------------------------------------------------
def _net_kernel(T, B, x_ref, wfeat_ref, wgates_ref, wout_ref, bias_ref, out_ref):
    dot = lambda a, b: jnp.dot(a, b, preferred_element_type=jnp.float32)

    bias = bias_ref[...]                     # [4, 3H] packed bias slab
    b_feat = bias[0:1, 0:GRU_IN]             # feature-extractor biases  [1, 48]
    b_gx = bias[1:2, 0:3 * H]                # (b_ir+b_hr | b_iz+b_hz | b_in) [1, 96]
    b_hn = bias[2:3, 0:H]                    # hidden-side new-gate bias [1, 32]
    b_out = bias[3:4, 0:1]                   # output bias               [1, 1]

    w_ih = wgates_ref[0:GRU_IN, :]           # fused input gate weights  [48, 96]
    w_hh = wgates_ref[GRU_IN:FEAT_IN, :]     # fused hidden gate weights [32, 96]

    # ---- Hoisted, non-recurrent compute over all T*B rows ----
    x = x_ref[...]                                               # [T*B, 80]
    feat = jnp.maximum(dot(x, wfeat_ref[...]) + b_feat, 0.0)     # [T*B, 48]
    gx = dot(feat, w_ih) + b_gx                                  # [T*B, 96] (r|z|n)

    # ---- Sequential GRU recurrence: only h @ W_hh + gate math per step ----
    h = jnp.zeros((B, H), jnp.float32)
    for t in range(T):                       # static unroll (T is small/static)
        gxt = gx[t * B:(t + 1) * B, :]       # [B, 96] contiguous sublane slice
        gh = dot(h, w_hh)                    # [B, 96]
        rz = jax.nn.sigmoid(gxt[:, 0:2 * H] + gh[:, 0:2 * H])
        r = rz[:, 0:H]
        z = rz[:, H:2 * H]
        n = jnp.tanh(gxt[:, 2 * H:3 * H] + r * (gh[:, 2 * H:3 * H] + b_hn))
        h = (1.0 - z) * n + z * h

    out_ref[...] = dot(h, wout_ref[...]) + b_out


# ----------------------------------------------------------------------------
# Parameter packing: 22 raw tensors -> 4 packed weight/bias arrays.
# ----------------------------------------------------------------------------
def _pack_params(p):
    # Block-diagonal feature weight mapping [u|s|up|sp] (80) -> [uo|so|upo|spo] (48).
    r0, r1 = 0, SERVICE_NUM
    r2 = r1 + USER_NUM
    r3 = r2 + SERVICE_NUM
    c0, c1 = 0, USER_FC_FEATURE_SIZE
    c2 = c1 + SERVICE_FC_FEATURE_SIZE
    c3 = c2 + USER_FC_FEATURE_SIZE
    w_feat = jnp.zeros((FEAT_IN, GRU_IN), jnp.float32)
    w_feat = w_feat.at[r0:r1, c0:c1].set(p['wu'])
    w_feat = w_feat.at[r1:r2, c1:c2].set(p['ws'])
    w_feat = w_feat.at[r2:r3, c2:c3].set(p['wup'])
    w_feat = w_feat.at[r3:FEAT_IN, c3:GRU_IN].set(p['wsp'])
    b_feat = jnp.concatenate([p['bu'], p['bs'], p['bup'], p['bsp']], axis=1)  # [1, 48]

    # Fused GRU gate weights (gate order r|z|n).
    w_ih = jnp.concatenate([p['wir'], p['wiz'], p['win']], axis=1)            # [48, 96]
    w_hh = jnp.concatenate([p['whr'], p['whz'], p['whn']], axis=1)            # [32, 96]
    w_gates = jnp.concatenate([w_ih, w_hh], axis=0)                           # [80, 96]

    # Pre-sum r/z biases; b_in goes with the x-side; b_hn must stay separate.
    b_gx = jnp.concatenate(
        [p['bir'] + p['bhr'], p['biz'] + p['bhz'], p['bin']], axis=1)         # [1, 96]

    bias = jnp.zeros((4, 3 * H), jnp.float32)
    bias = bias.at[0:1, 0:GRU_IN].set(b_feat)
    bias = bias.at[1:2, :].set(b_gx)
    bias = bias.at[2:3, 0:H].set(p['bhn'])
    bias = bias.at[3:4, 0:1].set(p['bout'])
    return w_feat, w_gates, p['wout'], bias


def net_forward(params, user_feat, user_pre, service_feat, service_pre):
    """user_feat/user_pre: [B, T, SERVICE_NUM]; service_feat/service_pre: [B, T, USER_NUM]."""
    B, T, _ = user_feat.shape
    w_feat, w_gates, w_out, bias = _pack_params(params)

    # Present one lane-dense [T*B, 80] slab (row index = t*B + b, time-major).
    x = jnp.concatenate([user_feat, service_feat, user_pre, service_pre], axis=2)
    x = jnp.transpose(x, (1, 0, 2)).reshape(T * B, FEAT_IN)

    kernel = functools.partial(_net_kernel, T, B)
    vmem = pl.BlockSpec(memory_space=pltpu.MemorySpace.VMEM)
    return pl.pallas_call(
        kernel,
        out_shape=jax.ShapeDtypeStruct((B, 1), jnp.float32),
        in_specs=[vmem] * 5,
        out_specs=vmem,
    )(x, w_feat, w_gates, w_out, bias)


# ----------------------------------------------------------------------------
# Deterministic parameter init (PyTorch-style uniform(-1/sqrt(fan_in), ...)).
# ----------------------------------------------------------------------------
def _init_linear(key, in_dim, out_dim):
    kw, kb = jax.random.split(key)
    bound = 1.0 / np.sqrt(in_dim)
    w = jax.random.uniform(kw, (in_dim, out_dim), jnp.float32, -bound, bound)
    b = jax.random.uniform(kb, (1, out_dim), jnp.float32, -bound, bound)
    return w, b


def init_params(key):
    keys = jax.random.split(key, 8)
    p = {}
    p['wu'], p['bu'] = _init_linear(keys[0], SERVICE_NUM, USER_FC_FEATURE_SIZE)
    p['ws'], p['bs'] = _init_linear(keys[1], USER_NUM, SERVICE_FC_FEATURE_SIZE)
    p['wup'], p['bup'] = _init_linear(keys[2], SERVICE_NUM, USER_FC_FEATURE_SIZE)
    p['wsp'], p['bsp'] = _init_linear(keys[3], USER_NUM, SERVICE_FC_FEATURE_SIZE)

    # GRU weights (PyTorch layout: weight_ih [3H, D], gate order r|z|n).
    D = GRU_IN
    bound = 1.0 / np.sqrt(H)
    kih, khh, kbih, kbhh = jax.random.split(keys[4], 4)
    w_ih = jax.random.uniform(kih, (3 * H, D), jnp.float32, -bound, bound)
    w_hh = jax.random.uniform(khh, (3 * H, H), jnp.float32, -bound, bound)
    b_ih = jax.random.uniform(kbih, (3 * H,), jnp.float32, -bound, bound)
    b_hh = jax.random.uniform(kbhh, (3 * H,), jnp.float32, -bound, bound)
    p['wir'], p['wiz'], p['win'] = (w_ih[0:H].T, w_ih[H:2 * H].T, w_ih[2 * H:].T)
    p['whr'], p['whz'], p['whn'] = (w_hh[0:H].T, w_hh[H:2 * H].T, w_hh[2 * H:].T)
    p['bir'], p['biz'], p['bin'] = (b_ih[0:H][None], b_ih[H:2 * H][None], b_ih[2 * H:][None])
    p['bhr'], p['bhz'], p['bhn'] = (b_hh[0:H][None], b_hh[H:2 * H][None], b_hh[2 * H:][None])

    p['wout'], p['bout'] = _init_linear(keys[5], LSTM_HIDDEN_UNIT, 1)
    # TODO(synk): `self.weight` (nn.Parameter) and `self.attention` are unused
    # in the PyTorch forward (dead code), so they are intentionally omitted.
    return p


# ----------------------------------------------------------------------------
# Pure-JAX reference (mirrors the PyTorch forward) for correctness checking.
# ----------------------------------------------------------------------------
def reference_forward(p, user_feat, user_pre, service_feat, service_pre):
    relu = lambda v: jnp.maximum(v, 0.0)
    B, T, _ = user_feat.shape
    uo = relu(user_feat @ p['wu'] + p['bu'])
    so = relu(service_feat @ p['ws'] + p['bs'])
    upo = relu(user_pre @ p['wup'] + p['bup'])
    spo = relu(service_pre @ p['wsp'] + p['bsp'])
    x = jnp.concatenate([uo, so, upo, spo], axis=2)   # [B, T, GRU_IN]
    h = jnp.zeros((B, LSTM_HIDDEN_UNIT), jnp.float32)
    for t in range(T):
        xt = x[:, t, :]
        r = jax.nn.sigmoid(xt @ p['wir'] + p['bir'] + h @ p['whr'] + p['bhr'])
        z = jax.nn.sigmoid(xt @ p['wiz'] + p['biz'] + h @ p['whz'] + p['bhz'])
        n = jnp.tanh(xt @ p['win'] + p['bin'] + r * (h @ p['whn'] + p['bhn']))
        h = (1.0 - z) * n + z * h
    return h @ p['wout'] + p['bout']


if __name__ == "__main__":
    key = jax.random.PRNGKey(0)
    kp, k1, k2, k3, k4 = jax.random.split(key, 5)
    params = init_params(kp)

    B, T = BATCH_SIZE, TIME_WINDOW
    user_feat = jax.random.normal(k1, (B, T, SERVICE_NUM), jnp.float32)
    user_pre = jax.random.normal(k2, (B, T, SERVICE_NUM), jnp.float32)
    service_feat = jax.random.normal(k3, (B, T, USER_NUM), jnp.float32)
    service_pre = jax.random.normal(k4, (B, T, USER_NUM), jnp.float32)

    out = net_forward(params, user_feat, user_pre, service_feat, service_pre)
    out = jax.block_until_ready(out)

    ref = reference_forward(params, user_feat, user_pre, service_feat, service_pre)
    np.testing.assert_allclose(np.asarray(out), np.asarray(ref), rtol=1e-4, atol=1e-4)
    assert out.shape == (B, 1)
    print("KERNEL_OK")
</pallas_src>

<mosaic_0001>
module attributes {stable_mosaic.version = 11 : i64} {
  func.func @_net_kernel(%arg0: memref<64x80xf32, #tpu.memory_space<vmem>>, %arg1: memref<80x48xf32, #tpu.memory_space<vmem>>, %arg2: memref<80x96xf32, #tpu.memory_space<vmem>>, %arg3: memref<32x1xf32, #tpu.memory_space<vmem>>, %arg4: memref<4x96xf32, #tpu.memory_space<vmem>>, %arg5: memref<8x1xf32, #tpu.memory_space<vmem>>) attributes {dimension_semantics = [], scalar_prefetch = 0 : i64, scratch_operands = 0 : i64, tpu.core_type = #tpu.core_type<tc>} {
    %c0 = arith.constant 0 : index
    %c0_0 = arith.constant 0 : index
    %0 = vector.load %arg4[%c0, %c0_0] : memref<4x96xf32, #tpu.memory_space<vmem>>, vector<4x96xf32>
    %1 = vector.extract_strided_slice %0 {offsets = [0, 0], sizes = [1, 48], strides = [1, 1]} : vector<4x96xf32> to vector<1x48xf32>
    %2 = vector.extract_strided_slice %0 {offsets = [1, 0], sizes = [1, 96], strides = [1, 1]} : vector<4x96xf32> to vector<1x96xf32>
    %3 = vector.extract_strided_slice %0 {offsets = [2, 0], sizes = [1, 32], strides = [1, 1]} : vector<4x96xf32> to vector<1x32xf32>
    %4 = vector.extract_strided_slice %0 {offsets = [3, 0], sizes = [1, 1], strides = [1, 1]} : vector<4x96xf32> to vector<1x1xf32>
    %c0_1 = arith.constant 0 : index
    %c0_2 = arith.constant 0 : index
    %5 = vector.load %arg2[%c0_1, %c0_2] : memref<80x96xf32, #tpu.memory_space<vmem>>, vector<48x96xf32>
    %c48 = arith.constant 48 : index
    %c0_3 = arith.constant 0 : index
    %6 = vector.load %arg2[%c48, %c0_3] : memref<80x96xf32, #tpu.memory_space<vmem>>, vector<32x96xf32>
    %c0_4 = arith.constant 0 : index
    %c0_5 = arith.constant 0 : index
    %7 = vector.load %arg0[%c0_4, %c0_5] : memref<64x80xf32, #tpu.memory_space<vmem>>, vector<64x80xf32>
    %c0_6 = arith.constant 0 : index
    %c0_7 = arith.constant 0 : index
    %8 = vector.load %arg1[%c0_6, %c0_7] : memref<80x48xf32, #tpu.memory_space<vmem>>, vector<80x48xf32>
    %cst = arith.constant dense<0.000000e+00> : vector<64x48xf32>
    %9 = tpu.matmul %7, %8, %cst {dimension_numbers = #tpu.dot_dimension_numbers<[1], [0], [0], [1], [0, 0, 1, 1], [], []>} : vector<64x80xf32>, vector<80x48xf32>, vector<64x48xf32> -> vector<64x48xf32>
    %10 = vector.broadcast %1 : vector<1x48xf32> to vector<64x48xf32>
    %11 = arith.addf %9, %10 : vector<64x48xf32>
    %cst_8 = arith.constant 0.000000e+00 : f32
    %12 = vector.broadcast %cst_8 : f32 to vector<64x48xf32>
    %13 = arith.maximumf %11, %12 : vector<64x48xf32>
    %cst_9 = arith.constant dense<0.000000e+00> : vector<64x96xf32>
    %14 = tpu.matmul %13, %5, %cst_9 {dimension_numbers = #tpu.dot_dimension_numbers<[1], [0], [0], [1], [0, 0, 1, 1], [], []>} : vector<64x48xf32>, vector<48x96xf32>, vector<64x96xf32> -> vector<64x96xf32>
    %15 = vector.broadcast %2 : vector<1x96xf32> to vector<64x96xf32>
    %16 = arith.addf %14, %15 : vector<64x96xf32>
    %cst_10 = arith.constant 0.000000e+00 : f32
    %17 = vector.broadcast %cst_10 : f32 to vector<8x32xf32>
    %18 = vector.extract_strided_slice %16 {offsets = [0, 0], sizes = [8, 96], strides = [1, 1]} : vector<64x96xf32> to vector<8x96xf32>
    %cst_11 = arith.constant dense<0.000000e+00> : vector<8x96xf32>
    %19 = tpu.matmul %17, %6, %cst_11 {dimension_numbers = #tpu.dot_dimension_numbers<[1], [0], [0], [1], [0, 0, 1, 1], [], []>} : vector<8x32xf32>, vector<32x96xf32>, vector<8x96xf32> -> vector<8x96xf32>
    %20 = vector.extract_strided_slice %18 {offsets = [0, 0], sizes = [8, 64], strides = [1, 1]} : vector<8x96xf32> to vector<8x64xf32>
    %21 = vector.extract_strided_slice %19 {offsets = [0, 0], sizes = [8, 64], strides = [1, 1]} : vector<8x96xf32> to vector<8x64xf32>
    %22 = arith.addf %20, %21 : vector<8x64xf32>
    %23 = arith.negf %22 : vector<8x64xf32>
    %24 = math.exp %23 : vector<8x64xf32>
    %cst_12 = arith.constant 1.000000e+00 : f32
    %25 = vector.broadcast %cst_12 : f32 to vector<8x64xf32>
    %26 = arith.addf %25, %24 : vector<8x64xf32>
    %27 = arith.divf %25, %26 : vector<8x64xf32>
    %28 = vector.extract_strided_slice %27 {offsets = [0, 0], sizes = [8, 32], strides = [1, 1]} : vector<8x64xf32> to vector<8x32xf32>
    %29 = vector.extract_strided_slice %27 {offsets = [0, 32], sizes = [8, 32], strides = [1, 1]} : vector<8x64xf32> to vector<8x32xf32>
    %30 = vector.extract_strided_slice %18 {offsets = [0, 64], sizes = [8, 32], strides = [1, 1]} : vector<8x96xf32> to vector<8x32xf32>
    %31 = vector.extract_strided_slice %19 {offsets = [0, 64], sizes = [8, 32], strides = [1, 1]} : vector<8x96xf32> to vector<8x32xf32>
    %32 = vector.broadcast %3 : vector<1x32xf32> to vector<8x32xf32>
    %33 = arith.addf %31, %32 : vector<8x32xf32>
    %34 = arith.mulf %28, %33 : vector<8x32xf32>
    %35 = arith.addf %30, %34 : vector<8x32xf32>
    %36 = math.tanh %35 : vector<8x32xf32>
    %cst_13 = arith.constant 1.000000e+00 : f32
    %37 = vector.broadcast %cst_13 : f32 to vector<8x32xf32>
    %38 = arith.subf %37, %29 : vector<8x32xf32>
    %39 = arith.mulf %38, %36 : vector<8x32xf32>
    %40 = arith.mulf %29, %17 : vector<8x32xf32>
    %41 = arith.addf %39, %40 : vector<8x32xf32>
    %42 = vector.extract_strided_slice %16 {offsets = [8, 0], sizes = [8, 96], strides = [1, 1]} : vector<64x96xf32> to vector<8x96xf32>
    %cst_14 = arith.constant dense<0.000000e+00> : vector<8x96xf32>
    %43 = tpu.matmul %41, %6, %cst_14 {dimension_numbers = #tpu.dot_dimension_numbers<[1], [0], [0], [1], [0, 0, 1, 1], [], []>} : vector<8x32xf32>, vector<32x96xf32>, vector<8x96xf32> -> vector<8x96xf32>
    %44 = vector.extract_strided_slice %42 {offsets = [0, 0], sizes = [8, 64], strides = [1, 1]} : vector<8x96xf32> to vector<8x64xf32>
    %45 = vector.extract_strided_slice %43 {offsets = [0, 0], sizes = [8, 64], strides = [1, 1]} : vector<8x96xf32> to vector<8x64xf32>
    %46 = arith.addf %44, %45 : vector<8x64xf32>
    %47 = arith.negf %46 : vector<8x64xf32>
    %48 = math.exp %47 : vector<8x64xf32>
    %cst_15 = arith.constant 1.000000e+00 : f32
    %49 = vector.broadcast %cst_15 : f32 to vector<8x64xf32>
    %50 = arith.addf %49, %48 : vector<8x64xf32>
    %51 = arith.divf %49, %50 : vector<8x64xf32>
    %52 = vector.extract_strided_slice %51 {offsets = [0, 0], sizes = [8, 32], strides = [1, 1]} : vector<8x64xf32> to vector<8x32xf32>
    %53 = vector.extract_strided_slice %51 {offsets = [0, 32], sizes = [8, 32], strides = [1, 1]} : vector<8x64xf32> to vector<8x32xf32>
    %54 = vector.extract_strided_slice %42 {offsets = [0, 64], sizes = [8, 32], strides = [1, 1]} : vector<8x96xf32> to vector<8x32xf32>
    %55 = vector.extract_strided_slice %43 {offsets = [0, 64], sizes = [8, 32], strides = [1, 1]} : vector<8x96xf32> to vector<8x32xf32>
    %56 = vector.broadcast %3 : vector<1x32xf32> to vector<8x32xf32>
    %57 = arith.addf %55, %56 : vector<8x32xf32>
    %58 = arith.mulf %52, %57 : vector<8x32xf32>
    %59 = arith.addf %54, %58 : vector<8x32xf32>
    %60 = math.tanh %59 : vector<8x32xf32>
    %cst_16 = arith.constant 1.000000e+00 : f32
    %61 = vector.broadcast %cst_16 : f32 to vector<8x32xf32>
    %62 = arith.subf %61, %53 : vector<8x32xf32>
    %63 = arith.mulf %62, %60 : vector<8x32xf32>
    %64 = arith.mulf %53, %41 : vector<8x32xf32>
    %65 = arith.addf %63, %64 : vector<8x32xf32>
    %66 = vector.extract_strided_slice %16 {offsets = [16, 0], sizes = [8, 96], strides = [1, 1]} : vector<64x96xf32> to vector<8x96xf32>
    %cst_17 = arith.constant dense<0.000000e+00> : vector<8x96xf32>
    %67 = tpu.matmul %65, %6, %cst_17 {dimension_numbers = #tpu.dot_dimension_numbers<[1], [0], [0], [1], [0, 0, 1, 1], [], []>} : vector<8x32xf32>, vector<32x96xf32>, vector<8x96xf32> -> vector<8x96xf32>
    %68 = vector.extract_strided_slice %66 {offsets = [0, 0], sizes = [8, 64], strides = [1, 1]} : vector<8x96xf32> to vector<8x64xf32>
    %69 = vector.extract_strided_slice %67 {offsets = [0, 0], sizes = [8, 64], strides = [1, 1]} : vector<8x96xf32> to vector<8x64xf32>
    %70 = arith.addf %68, %69 : vector<8x64xf32>
    %71 = arith.negf %70 : vector<8x64xf32>
    %72 = math.exp %71 : vector<8x64xf32>
    %cst_18 = arith.constant 1.000000e+00 : f32
    %73 = vector.broadcast %cst_18 : f32 to vector<8x64xf32>
    %74 = arith.addf %73, %72 : vector<8x64xf32>
    %75 = arith.divf %73, %74 : vector<8x64xf32>
    %76 = vector.extract_strided_slice %75 {offsets = [0, 0], sizes = [8, 32], strides = [1, 1]} : vector<8x64xf32> to vector<8x32xf32>
    %77 = vector.extract_strided_slice %75 {offsets = [0, 32], sizes = [8, 32], strides = [1, 1]} : vector<8x64xf32> to vector<8x32xf32>
    %78 = vector.extract_strided_slice %66 {offsets = [0, 64], sizes = [8, 32], strides = [1, 1]} : vector<8x96xf32> to vector<8x32xf32>
    %79 = vector.extract_strided_slice %67 {offsets = [0, 64], sizes = [8, 32], strides = [1, 1]} : vector<8x96xf32> to vector<8x32xf32>
    %80 = vector.broadcast %3 : vector<1x32xf32> to vector<8x32xf32>
    %81 = arith.addf %79, %80 : vector<8x32xf32>
    %82 = arith.mulf %76, %81 : vector<8x32xf32>
    %83 = arith.addf %78, %82 : vector<8x32xf32>
    %84 = math.tanh %83 : vector<8x32xf32>
    %cst_19 = arith.constant 1.000000e+00 : f32
    %85 = vector.broadcast %cst_19 : f32 to vector<8x32xf32>
    %86 = arith.subf %85, %77 : vector<8x32xf32>
    %87 = arith.mulf %86, %84 : vector<8x32xf32>
    %88 = arith.mulf %77, %65 : vector<8x32xf32>
    %89 = arith.addf %87, %88 : vector<8x32xf32>
    %90 = vector.extract_strided_slice %16 {offsets = [24, 0], sizes = [8, 96], strides = [1, 1]} : vector<64x96xf32> to vector<8x96xf32>
    %cst_20 = arith.constant dense<0.000000e+00> : vector<8x96xf32>
    %91 = tpu.matmul %89, %6, %cst_20 {dimension_numbers = #tpu.dot_dimension_numbers<[1], [0], [0], [1], [0, 0, 1, 1], [], []>} : vector<8x32xf32>, vector<32x96xf32>, vector<8x96xf32> -> vector<8x96xf32>
    %92 = vector.extract_strided_slice %90 {offsets = [0, 0], sizes = [8, 64], strides = [1, 1]} : vector<8x96xf32> to vector<8x64xf32>
    %93 = vector.extract_strided_slice %91 {offsets = [0, 0], sizes = [8, 64], strides = [1, 1]} : vector<8x96xf32> to vector<8x64xf32>
    %94 = arith.addf %92, %93 : vector<8x64xf32>
    %95 = arith.negf %94 : vector<8x64xf32>
    %96 = math.exp %95 : vector<8x64xf32>
    %cst_21 = arith.constant 1.000000e+00 : f32
    %97 = vector.broadcast %cst_21 : f32 to vector<8x64xf32>
    %98 = arith.addf %97, %96 : vector<8x64xf32>
    %99 = arith.divf %97, %98 : vector<8x64xf32>
    %100 = vector.extract_strided_slice %99 {offsets = [0, 0], sizes = [8, 32], strides = [1, 1]} : vector<8x64xf32> to vector<8x32xf32>
    %101 = vector.extract_strided_slice %99 {offsets = [0, 32], sizes = [8, 32], strides = [1, 1]} : vector<8x64xf32> to vector<8x32xf32>
    %102 = vector.extract_strided_slice %90 {offsets = [0, 64], sizes = [8, 32], strides = [1, 1]} : vector<8x96xf32> to vector<8x32xf32>
    %103 = vector.extract_strided_slice %91 {offsets = [0, 64], sizes = [8, 32], strides = [1, 1]} : vector<8x96xf32> to vector<8x32xf32>
    %104 = vector.broadcast %3 : vector<1x32xf32> to vector<8x32xf32>
    %105 = arith.addf %103, %104 : vector<8x32xf32>
    %106 = arith.mulf %100, %105 : vector<8x32xf32>
    %107 = arith.addf %102, %106 : vector<8x32xf32>
    %108 = math.tanh %107 : vector<8x32xf32>
    %cst_22 = arith.constant 1.000000e+00 : f32
    %109 = vector.broadcast %cst_22 : f32 to vector<8x32xf32>
    %110 = arith.subf %109, %101 : vector<8x32xf32>
    %111 = arith.mulf %110, %108 : vector<8x32xf32>
    %112 = arith.mulf %101, %89 : vector<8x32xf32>
    %113 = arith.addf %111, %112 : vector<8x32xf32>
    %114 = vector.extract_strided_slice %16 {offsets = [32, 0], sizes = [8, 96], strides = [1, 1]} : vector<64x96xf32> to vector<8x96xf32>
    %cst_23 = arith.constant dense<0.000000e+00> : vector<8x96xf32>
    %115 = tpu.matmul %113, %6, %cst_23 {dimension_numbers = #tpu.dot_dimension_numbers<[1], [0], [0], [1], [0, 0, 1, 1], [], []>} : vector<8x32xf32>, vector<32x96xf32>, vector<8x96xf32> -> vector<8x96xf32>
    %116 = vector.extract_strided_slice %114 {offsets = [0, 0], sizes = [8, 64], strides = [1, 1]} : vector<8x96xf32> to vector<8x64xf32>
    %117 = vector.extract_strided_slice %115 {offsets = [0, 0], sizes = [8, 64], strides = [1, 1]} : vector<8x96xf32> to vector<8x64xf32>
    %118 = arith.addf %116, %117 : vector<8x64xf32>
    %119 = arith.negf %118 : vector<8x64xf32>
    %120 = math.exp %119 : vector<8x64xf32>
    %cst_24 = arith.constant 1.000000e+00 : f32
    %121 = vector.broadcast %cst_24 : f32 to vector<8x64xf32>
    %122 = arith.addf %121, %120 : vector<8x64xf32>
    %123 = arith.divf %121, %122 : vector<8x64xf32>
    %124 = vector.extract_strided_slice %123 {offsets = [0, 0], sizes = [8, 32], strides = [1, 1]} : vector<8x64xf32> to vector<8x32xf32>
    %125 = vector.extract_strided_slice %123 {offsets = [0, 32], sizes = [8, 32], strides = [1, 1]} : vector<8x64xf32> to vector<8x32xf32>
    %126 = vector.extract_strided_slice %114 {offsets = [0, 64], sizes = [8, 32], strides = [1, 1]} : vector<8x96xf32> to vector<8x32xf32>
    %127 = vector.extract_strided_slice %115 {offsets = [0, 64], sizes = [8, 32], strides = [1, 1]} : vector<8x96xf32> to vector<8x32xf32>
    %128 = vector.broadcast %3 : vector<1x32xf32> to vector<8x32xf32>
    %129 = arith.addf %127, %128 : vector<8x32xf32>
    %130 = arith.mulf %124, %129 : vector<8x32xf32>
    %131 = arith.addf %126, %130 : vector<8x32xf32>
    %132 = math.tanh %131 : vector<8x32xf32>
    %cst_25 = arith.constant 1.000000e+00 : f32
    %133 = vector.broadcast %cst_25 : f32 to vector<8x32xf32>
    %134 = arith.subf %133, %125 : vector<8x32xf32>
    %135 = arith.mulf %134, %132 : vector<8x32xf32>
    %136 = arith.mulf %125, %113 : vector<8x32xf32>
    %137 = arith.addf %135, %136 : vector<8x32xf32>
    %138 = vector.extract_strided_slice %16 {offsets = [40, 0], sizes = [8, 96], strides = [1, 1]} : vector<64x96xf32> to vector<8x96xf32>
    %cst_26 = arith.constant dense<0.000000e+00> : vector<8x96xf32>
    %139 = tpu.matmul %137, %6, %cst_26 {dimension_numbers = #tpu.dot_dimension_numbers<[1], [0], [0], [1], [0, 0, 1, 1], [], []>} : vector<8x32xf32>, vector<32x96xf32>, vector<8x96xf32> -> vector<8x96xf32>
    %140 = vector.extract_strided_slice %138 {offsets = [0, 0], sizes = [8, 64], strides = [1, 1]} : vector<8x96xf32> to vector<8x64xf32>
    %141 = vector.extract_strided_slice %139 {offsets = [0, 0], sizes = [8, 64], strides = [1, 1]} : vector<8x96xf32> to vector<8x64xf32>
    %142 = arith.addf %140, %141 : vector<8x64xf32>
    %143 = arith.negf %142 : vector<8x64xf32>
    %144 = math.exp %143 : vector<8x64xf32>
    %cst_27 = arith.constant 1.000000e+00 : f32
    %145 = vector.broadcast %cst_27 : f32 to vector<8x64xf32>
    %146 = arith.addf %145, %144 : vector<8x64xf32>
    %147 = arith.divf %145, %146 : vector<8x64xf32>
    %148 = vector.extract_strided_slice %147 {offsets = [0, 0], sizes = [8, 32], strides = [1, 1]} : vector<8x64xf32> to vector<8x32xf32>
    %149 = vector.extract_strided_slice %147 {offsets = [0, 32], sizes = [8, 32], strides = [1, 1]} : vector<8x64xf32> to vector<8x32xf32>
    %150 = vector.extract_strided_slice %138 {offsets = [0, 64], sizes = [8, 32], strides = [1, 1]} : vector<8x96xf32> to vector<8x32xf32>
    %151 = vector.extract_strided_slice %139 {offsets = [0, 64], sizes = [8, 32], strides = [1, 1]} : vector<8x96xf32> to vector<8x32xf32>
    %152 = vector.broadcast %3 : vector<1x32xf32> to vector<8x32xf32>
    %153 = arith.addf %151, %152 : vector<8x32xf32>
    %154 = arith.mulf %148, %153 : vector<8x32xf32>
    %155 = arith.addf %150, %154 : vector<8x32xf32>
    %156 = math.tanh %155 : vector<8x32xf32>
    %cst_28 = arith.constant 1.000000e+00 : f32
    %157 = vector.broadcast %cst_28 : f32 to vector<8x32xf32>
    %158 = arith.subf %157, %149 : vector<8x32xf32>
    %159 = arith.mulf %158, %156 : vector<8x32xf32>
    %160 = arith.mulf %149, %137 : vector<8x32xf32>
    %161 = arith.addf %159, %160 : vector<8x32xf32>
    %162 = vector.extract_strided_slice %16 {offsets = [48, 0], sizes = [8, 96], strides = [1, 1]} : vector<64x96xf32> to vector<8x96xf32>
    %cst_29 = arith.constant dense<0.000000e+00> : vector<8x96xf32>
    %163 = tpu.matmul %161, %6, %cst_29 {dimension_numbers = #tpu.dot_dimension_numbers<[1], [0], [0], [1], [0, 0, 1, 1], [], []>} : vector<8x32xf32>, vector<32x96xf32>, vector<8x96xf32> -> vector<8x96xf32>
    %164 = vector.extract_strided_slice %162 {offsets = [0, 0], sizes = [8, 64], strides = [1, 1]} : vector<8x96xf32> to vector<8x64xf32>
    %165 = vector.extract_strided_slice %163 {offsets = [0, 0], sizes = [8, 64], strides = [1, 1]} : vector<8x96xf32> to vector<8x64xf32>
    %166 = arith.addf %164, %165 : vector<8x64xf32>
    %167 = arith.negf %166 : vector<8x64xf32>
    %168 = math.exp %167 : vector<8x64xf32>
    %cst_30 = arith.constant 1.000000e+00 : f32
    %169 = vector.broadcast %cst_30 : f32 to vector<8x64xf32>
    %170 = arith.addf %169, %168 : vector<8x64xf32>
    %171 = arith.divf %169, %170 : vector<8x64xf32>
    %172 = vector.extract_strided_slice %171 {offsets = [0, 0], sizes = [8, 32], strides = [1, 1]} : vector<8x64xf32> to vector<8x32xf32>
    %173 = vector.extract_strided_slice %171 {offsets = [0, 32], sizes = [8, 32], strides = [1, 1]} : vector<8x64xf32> to vector<8x32xf32>
    %174 = vector.extract_strided_slice %162 {offsets = [0, 64], sizes = [8, 32], strides = [1, 1]} : vector<8x96xf32> to vector<8x32xf32>
    %175 = vector.extract_strided_slice %163 {offsets = [0, 64], sizes = [8, 32], strides = [1, 1]} : vector<8x96xf32> to vector<8x32xf32>
    %176 = vector.broadcast %3 : vector<1x32xf32> to vector<8x32xf32>
    %177 = arith.addf %175, %176 : vector<8x32xf32>
    %178 = arith.mulf %172, %177 : vector<8x32xf32>
    %179 = arith.addf %174, %178 : vector<8x32xf32>
    %180 = math.tanh %179 : vector<8x32xf32>
    %cst_31 = arith.constant 1.000000e+00 : f32
    %181 = vector.broadcast %cst_31 : f32 to vector<8x32xf32>
    %182 = arith.subf %181, %173 : vector<8x32xf32>
    %183 = arith.mulf %182, %180 : vector<8x32xf32>
    %184 = arith.mulf %173, %161 : vector<8x32xf32>
    %185 = arith.addf %183, %184 : vector<8x32xf32>
    %186 = vector.extract_strided_slice %16 {offsets = [56, 0], sizes = [8, 96], strides = [1, 1]} : vector<64x96xf32> to vector<8x96xf32>
    %cst_32 = arith.constant dense<0.000000e+00> : vector<8x96xf32>
    %187 = tpu.matmul %185, %6, %cst_32 {dimension_numbers = #tpu.dot_dimension_numbers<[1], [0], [0], [1], [0, 0, 1, 1], [], []>} : vector<8x32xf32>, vector<32x96xf32>, vector<8x96xf32> -> vector<8x96xf32>
    %188 = vector.extract_strided_slice %186 {offsets = [0, 0], sizes = [8, 64], strides = [1, 1]} : vector<8x96xf32> to vector<8x64xf32>
    %189 = vector.extract_strided_slice %187 {offsets = [0, 0], sizes = [8, 64], strides = [1, 1]} : vector<8x96xf32> to vector<8x64xf32>
    %190 = arith.addf %188, %189 : vector<8x64xf32>
    %191 = arith.negf %190 : vector<8x64xf32>
    %192 = math.exp %191 : vector<8x64xf32>
    %cst_33 = arith.constant 1.000000e+00 : f32
    %193 = vector.broadcast %cst_33 : f32 to vector<8x64xf32>
    %194 = arith.addf %193, %192 : vector<8x64xf32>
    %195 = arith.divf %193, %194 : vector<8x64xf32>
    %196 = vector.extract_strided_slice %195 {offsets = [0, 0], sizes = [8, 32], strides = [1, 1]} : vector<8x64xf32> to vector<8x32xf32>
    %197 = vector.extract_strided_slice %195 {offsets = [0, 32], sizes = [8, 32], strides = [1, 1]} : vector<8x64xf32> to vector<8x32xf32>
    %198 = vector.extract_strided_slice %186 {offsets = [0, 64], sizes = [8, 32], strides = [1, 1]} : vector<8x96xf32> to vector<8x32xf32>
    %199 = vector.extract_strided_slice %187 {offsets = [0, 64], sizes = [8, 32], strides = [1, 1]} : vector<8x96xf32> to vector<8x32xf32>
    %200 = vector.broadcast %3 : vector<1x32xf32> to vector<8x32xf32>
    %201 = arith.addf %199, %200 : vector<8x32xf32>
    %202 = arith.mulf %196, %201 : vector<8x32xf32>
    %203 = arith.addf %198, %202 : vector<8x32xf32>
    %204 = math.tanh %203 : vector<8x32xf32>
    %cst_34 = arith.constant 1.000000e+00 : f32
    %205 = vector.broadcast %cst_34 : f32 to vector<8x32xf32>
    %206 = arith.subf %205, %197 : vector<8x32xf32>
    %207 = arith.mulf %206, %204 : vector<8x32xf32>
    %208 = arith.mulf %197, %185 : vector<8x32xf32>
    %209 = arith.addf %207, %208 : vector<8x32xf32>
    %c0_35 = arith.constant 0 : index
    %c0_36 = arith.constant 0 : index
    %210 = vector.load %arg3[%c0_35, %c0_36] : memref<32x1xf32, #tpu.memory_space<vmem>>, vector<32x1xf32>
    %cst_37 = arith.constant dense<0.000000e+00> : vector<8x1xf32>
    %211 = tpu.matmul %209, %210, %cst_37 {dimension_numbers = #tpu.dot_dimension_numbers<[1], [0], [0], [1], [0, 0, 1, 1], [], []>} : vector<8x32xf32>, vector<32x1xf32>, vector<8x1xf32> -> vector<8x1xf32>
    %212 = vector.broadcast %4 : vector<1x1xf32> to vector<8x1xf32>
    %213 = arith.addf %211, %212 : vector<8x1xf32>
    %c0_38 = arith.constant 0 : index
    %c0_39 = arith.constant 0 : index
    %214 = vector.load %arg5[%c0_38, %c0_39] : memref<8x1xf32, #tpu.memory_space<vmem>>, vector<8x1xf32>
    tpu.vector_store %arg5[%c0_38, %c0_39], %213 {strides = array<i32>} : memref<8x1xf32, #tpu.memory_space<vmem>>, vector<8x1xf32>,
    return
  }
}

</mosaic_0001>

<bundles_post_ra>
// kernel: tpu_custom_call.1
= control target key start
LH: loop header
LB: loop body
LE: loop exit
PB: predicated region body
PF: predicated region fallthrough
CT: control target
= control target key end

     0   :  { %vm50_vm0 = vcmask 654336   ;;  %vm125_vm1 = vcmask 392192   ;;  %v851_v47 = vmov 0.0   ;;  %vm191_vm6 = vcmask 261120   ;;  %s1112_s1 = inlined_call_operand.vmem [shape: f32[80,48], index: 1, kind: input, shape index: {}]   ;;  %s1113_s0 = inlined_call_operand.vmem [shape: f32[64,80], index: 0, kind: input, shape index: {}]   ;;  %s1114_s2 = inlined_call_operand.vmem [shape: f32[80,96], index: 2, kind: input, shape index: {}]   ;;  %s1115_s4 = inlined_call_operand.vmem [shape: f32[4,96], index: 4, kind: input, shape index: {}]   ;;  %s1116_s3 = inlined_call_operand.vmem [shape: f32[32,1], index: 3, kind: input, shape index: {}]   ;;  %s1117_s5 = inlined_call_operand.vmem [shape: f32[8,1], index: 5, kind: output, shape index: {}]  }
   0x1   :  { %v48_v0 = vld [vmem:[%s1112_s1 + $0x48] sm:$0xff]  ;;  %v47_v1 = vld [vmem:[%s1112_s1 + $0x40] sm:$0xff]  ;;  %v46_v2 = vld [vmem:[%s1112_s1 + $0x38] sm:$0xff] }
   0x2   :  { %81 = vmatpush.msra.mxu0 %v48_v0  ;;  %783 = vmatpush.msra.mxu3 %v48_v0  ;;  %v45_v3 = vld [vmem:[%s1112_s1 + $0x30] sm:$0xff]  ;;  %v44_v4 = vld [vmem:[%s1112_s1 + $0x28] sm:$0xff]  ;;  %v43_v5 = vld [vmem:[%s1112_s1 + $0x20] sm:$0xff] }
   0x3   :  { %v42_v6 = vld [vmem:[%s1112_s1 + $0x18] sm:$0xff]  ;;  %v41_v7 = vld [vmem:[%s1112_s1 + $0x10] sm:$0xff]  ;;  %v40_v8 = vld [vmem:[%s1112_s1 + $0x8] sm:$0xff] }
   0x4   :  { %82 = vmatpush.msra.mxu0 %v47_v1  ;;  %784 = vmatpush.msra.mxu3 %v47_v1  ;;  %v39_v9 = vld [vmem:[%s1112_s1] sm:$0xff]  ;;  %v37_v11 = vld [vmem:[%s1113_s0 + $0x30] sm:$0xff]  ;;  %v32_v12 = vld [vmem:[%s1113_s0 + $0x8] sm:$0xff] }
   0x5   :  { %v31_v10 = vld [vmem:[%s1113_s0] sm:$0xff]  ;;  %v38_v13 = vld [vmem:[%s1113_s0 + $0x38] sm:$0xff]  ;;  %v26_v14 = vld [vmem:[%s1114_s2 + $0x28] sm:$0xff] }
   0x6   :  { %83 = vmatpush.msra.mxu0 %v46_v2  ;;  %785 = vmatpush.msra.mxu3 %v46_v2  ;;  %v25_v15 = vld [vmem:[%s1114_s2 + $0x20] sm:$0xff]  ;;  %v24_v16 = vld [vmem:[%s1114_s2 + $0x18] sm:$0xff]  ;;  %v33_v17 = vld [vmem:[%s1113_s0 + $0x10] sm:$0xff] }
   0x7   :  { %160 = vmatpush.msra.mxu1 %v26_v14  ;;  %793 = vmatpush.msra.mxu2 %v26_v14  ;;  %v34_v18 = vld [vmem:[%s1113_s0 + $0x18] sm:$0xff]  ;;  %v35_v19 = vld [vmem:[%s1113_s0 + $0x20] sm:$0xff]  ;;  %v36_v20 = vld [vmem:[%s1113_s0 + $0x28] sm:$0xff] }
   0x8   :  { %84 = vmatpush.msra.mxu0 %v45_v3  ;;  %786 = vmatpush.msra.mxu3 %v45_v3  ;;  %v23_v21 = vld [vmem:[%s1114_s2 + $0x10] sm:$0xff]  ;;  %v22_v22 = vld [vmem:[%s1114_s2 + $0x8] sm:$0xff]  ;;  %v21_v23 = vld [vmem:[%s1114_s2] sm:$0xff] }
   0x9   :  { %161 = vmatpush.msra.mxu1 %v25_v15  ;;  %794 = vmatpush.msra.mxu2 %v25_v15  ;;  %v966_v24 = vld [vmem:[%s1114_s2 + $0x48] sm:$0xff]  ;;  %v973_v25 = vld [vmem:[%s1114_s2 + $0x40] sm:$0xff]  ;;  %v978_v26 = vld [vmem:[%s1114_s2 + $0x38] sm:$0xff] }
   0xa   :  { %85 = vmatpush.msra.mxu0 %v44_v4  ;;  %787 = vmatpush.msra.mxu3 %v44_v4  ;;  %v987_v27 = vld [vmem:[%s1114_s2 + $0x30] sm:$0xff]  ;;  %v992_v28 = vld [vmem:[%s1115_s4] sm:$0xf]  ;;  %s850_s2 = smov 64   ;;  %s852_s4 = smov 96  }
   0xb   :  { %162 = vmatpush.msra.mxu1 %v24_v16  ;;  %795 = vmatpush.msra.mxu2 %v24_v16  ;;  %v49_v29 = vperm.slane %v992_v28, 0  ;;  %v235_v36 = vperm.slane %v992_v28, 2  ;;  %v1020_v56 = vperm.slane %v992_v28, 1 }
   0xc   :  { %86 = vmatpush.msra.mxu0 %v43_v5  ;;  %788 = vmatpush.msra.mxu3 %v43_v5 }
   0xd   :  { %163 = vmatpush.msra.mxu1 %v23_v21  ;;  %796 = vmatpush.msra.mxu2 %v23_v21 }
   0xe   :  { %87 = vmatpush.msra.mxu0 %v42_v6  ;;  %789 = vmatpush.msra.mxu3 %v42_v6 }
   0xf   :  { %164 = vmatpush.msra.mxu1 %v22_v22  ;;  %797 = vmatpush.msra.mxu2 %v22_v22 }
  0x10   :  { %88 = vmatpush.msra.mxu0 %v41_v7  ;;  %790 = vmatpush.msra.mxu3 %v41_v7 }
  0x11   :  { %165 = vmatpush.msra.mxu1 %v21_v23  ;;  %798 = vmatpush.msra.mxu2 %v21_v23 }
  0x12   :  { %89 = vmatpush.msra.mxu0 %v40_v8  ;;  %791 = vmatpush.msra.mxu3 %v40_v8 }
  0x13   :  { %207 = vmatpush.msrb.mxu2 %v966_v24  ;;  %237 = vrot.lane.b32.xlu0 %v235_v36, %s850_s2 }
  0x14   :  { %90 = vmatpush.msra.mxu0 %v39_v9  ;;  %792 = vmatpush.msra.mxu3 %v39_v9 }
  0x15   :  { %751 = vmatmul.msk.f32.vlgmr.msra.gmra.mxu0 %vm50_vm0, %v31_v10  ;;  %757 = vmatmul.msk.f32.vlgmr.msra.gmra.mxu3 %vm50_vm0, %v37_v11 }
  0x16   :  { %277 = vmatpush.msrb.mxu3 %v966_v24  ;;  %208 = vmatpush.msrb.mxu2 %v973_v25 }
  0x18   :  { %278 = vmatpush.msrb.mxu3 %v973_v25  ;;  %209 = vmatpush.msrb.mxu2 %v978_v26 }
  0x1a   :  { %279 = vmatpush.msrb.mxu3 %v978_v26  ;;  %210 = vmatpush.msrb.mxu2 %v987_v27 }
  0x1c   :  { %280 = vmatpush.msrb.mxu3 %v987_v27 }
  0x1d   :  { %752 = vmatmul.msk.f32.gmra.mxu0 %vm50_vm0, %v32_v12  ;;  %758 = vmatmul.msk.f32.gmra.mxu3 %vm50_vm0, %v38_v13 }
  0x1e   :  { %407 = vmatpush.msra.mxu3 %v966_v24 }
  0x20   :  { %408 = vmatpush.msra.mxu3 %v973_v25 }
  0x22   :  { %409 = vmatpush.msra.mxu3 %v978_v26 }
  0x24   :  { %410 = vmatpush.msra.mxu3 %v987_v27 }
  0x25   :  { %753 = vmatmul.msk.f32.gmra.mxu0 %vm50_vm0, %v33_v17 }
  0x2d   :  { %754 = vmatmul.msk.f32.gmra.mxu0 %vm50_vm0, %v34_v18 }
  0x35   :  { %755 = vmatmul.msk.f32.gmra.mxu0 %vm50_vm0, %v35_v19 }
  0x3d   :  { %756 = vmatmul.msk.f32.gmra.mxu0 %vm50_vm0, %v36_v20 }
  0x85   :  { %v1025_v59 = vpop.permute.xlu0 %237 }
  0x92   :  { %v92_v30 = vpop.f32.mrf.mxu0 }
  0x93   :  { %v93_v31 = vadd.f32 %v92_v30, %v49_v29 }
  0x95   :  { %v116_v32 = vmax.f32 %v93_v31, 0.0 }
  0x97   :  { %759 = vmatmul.msk.f32.vlgmr.msra.gmra.mxu1 %vm125_vm1, %v116_v32 }
  0x98   :  { %v110_v33 = vpop.f32.mrf.mxu3 }
  0x99   :  { %v111_v54 = vadd.f32 %v110_v33, %v49_v29 }
  0x9a   :  { %v95_v34 = vpop.f32.mrf.mxu0 }
  0x9b   :  { %v96_v35 = vadd.f32 %v95_v34, %v49_v29  ;;  %v122_v55 = vmax.f32 %v111_v54, 0.0 }
  0x9d   :  { %v117_v37 = vmax.f32 %v96_v35, 0.0 }
  0x9f   :  { %760 = vmatmul.msk.f32.gmra.mxu1 %vm125_vm1, %v117_v37 }
  0xa0   :  { %v113_v38 = vpop.f32.mrf.mxu3 }
  0xa1   :  { %v114_v39 = vadd.f32 %v113_v38, %v49_v29 }
  0xa2   :  { %v98_v40 = vpop.f32.mrf.mxu0 }
  0xa3   :  { %v123_v41 = vmax.f32 %v114_v39, 0.0  ;;  %v99_v42 = vadd.f32 %v98_v40, %v49_v29 }
  0xa5   :  { %v118_v43 = vmax.f32 %v99_v42, 0.0  ;;  %766 = vmatmul.msk.f32.vlgmr.msra.gmra.mxu2 %vm125_vm1, %v123_v41 }
  0xa6   :  { %342 = vmatpush.msra.mxu2 %v966_v24 }
  0xa7   :  { %761 = vmatmul.msk.f32.gmra.mxu1 %vm125_vm1, %v118_v43 }
  0xa8   :  { %343 = vmatpush.msra.mxu2 %v973_v25 }
  0xaa   :  { %v101_v44 = vpop.f32.mrf.mxu0  ;;  %344 = vmatpush.msra.mxu2 %v978_v26 }
  0xab   :  { %v102_v45 = vadd.f32 %v101_v44, %v49_v29 }
  0xac   :  { %345 = vmatpush.msra.mxu2 %v987_v27 }
  0xad   :  { %v119_v46 = vmax.f32 %v102_v45, 0.0  ;;  %211 = vmatmul.f32.vlgmr.msrb.gmra.mxu2 %v851_v47 }
  0xae   :  { %472 = vmatpush.msrb.mxu2 %v966_v24 }
  0xaf   :  { %762 = vmatmul.msk.f32.gmra.mxu1 %vm125_vm1, %v119_v46 }
  0xb0   :  { %473 = vmatpush.msrb.mxu2 %v973_v25 }
  0xb2   :  { %v104_v48 = vpop.f32.mrf.mxu0  ;;  %474 = vmatpush.msrb.mxu2 %v978_v26 }
  0xb3   :  { %v105_v49 = vadd.f32 %v104_v48, %v49_v29 }
  0xb4   :  { %475 = vmatpush.msrb.mxu2 %v987_v27 }
  0xb5   :  { %v120_v50 = vmax.f32 %v105_v49, 0.0 }
  0xb7   :  { %763 = vmatmul.msk.f32.gmra.mxu1 %vm125_vm1, %v120_v50 }
  0xba   :  { %v107_v51 = vpop.f32.mrf.mxu0 }
  0xbb   :  { %v108_v52 = vadd.f32 %v107_v51, %v49_v29 }
  0xbd   :  { %v121_v53 = vmax.f32 %v108_v52, 0.0 }
  0xbf   :  { %764 = vmatmul.msk.f32.gmra.mxu1 %vm125_vm1, %v121_v53 }
  0xc7   :  { %765 = vmatmul.msk.f32.gmra.mxu1 %vm125_vm1, %v122_v55 }
 0x114   :  { %v167_v62 = vpop.f32.mrf.mxu1 }
 0x115   :  { %v168_v63 = vadd.f32 %v167_v62, %v1020_v56 }
 0x11c   :  { %v170_v32 = vpop.f32.mrf.mxu1 }
 0x11d   :  { %v171_v33 = vadd.f32 %v170_v32, %v1020_v56 }
 0x128   :  { %v188_v57 = vpop.f32.mrf.mxu2 }
 0x129   :  { %v1023_v58 = vadd.f32 %v188_v57, %v1020_v56 }
 0x130   :  { %v212_v60 = vpop.f32.mrf.mxu2 }
 0x131   :  { %v240_v61 = vadd.f32 %v1025_v59, %v212_v60  ;;  %v215_v0 = vadd.f32 %v212_v60, %v168_v63 }
 0x133   :  { %242 = vrot.lane.b32.xlu0 %v240_v61, %s850_s2  ;;  %v767_v1 = vmul.f32 -1.442695, %v215_v0  ;;  %v173_v0 = vpop.f32.mrf.mxu1 }
 0x135   :  { %802 = vpow2.f32 %v767_v1  ;;  %v174_v1 = vadd.f32 %v173_v0, %v1020_v56 }
 0x13b   :  { %v803_v2 = vpop.eup %802 }
 0x13c   :  { %v219_v3 = vadd.f32 1.0, %v803_v2 }
 0x13e   :  { %804 = vrcp.f32 %v219_v3  ;;  %v231_v9 = vand.u32 2147483648, %v219_v3  ;;  %vm225_vm3 = vweird.f32 %v219_v3  ;;  %v229_v10 = vand.u32 2147483647, %v219_v3 }
 0x140   :  { %v232_v12 = vor.u32 1.1754944e-38, %v231_v9  ;;  %vm230_vm5 = vcmp.eq.f32.partialorder %v229_v10, 8.507059e+37 }
 0x144   :  { %v805_v4 = vpop.eup %804 }
 0x145   :  { %v221_v5 = vmul.f32 %v805_v4, %v219_v3  ;;  %vm226_vm2 = vweird.f32 %v805_v4 }
 0x146   :  { %vm227_vm4 = vmor %vm225_vm3, %vm226_vm2 }
 0x147   :  { %v222_v6 = vsub.f32 1.0, %v221_v5 }
 0x149   :  { %v223_v7 = vmul.f32 %v805_v4, %v222_v6 }
 0x14b   :  { %v224_v8 = vadd.f32 %v805_v4, %v223_v7 }
 0x14d   :  { %v228_v11 = vsel %vm227_vm4, %v805_v4, %v224_v8 }
 0x14e   :  { %v233_v14 = vsel %vm230_vm5, %v232_v12, %v228_v11 }
 0x14f   :  { %v252_v19 = vsub.f32 1.0, %v233_v14  ;;  %v258_v22 = vmul.f32 0.0, %v233_v14 }
 0x1a5   :  { %v243_v13 = vpop.permute.xlu0 %242 }
 0x1a6   :  { %v245_v15 = vmul.f32 %v243_v13, %v233_v14 }
 0x1a8   :  { %247 = vrot.lane.b32.xlu1 %v245_v15, %s850_s2 }
 0x21a   :  { %v248_v16 = vpop.permute.xlu1 %247 }
 0x21b   :  { %v250_v17 = vadd.f32 %v248_v16, %v168_v63 }
 0x21d   :  { %806 = vtanh.f32 %v250_v17 }
 0x223   :  { %v807_v18 = vpop.eup %806 }
 0x224   :  { %254 = vrot.lane.b32.xlu1 %v807_v18, %s852_s4 }
 0x296   :  { %v255_v20 = vpop.permute.xlu1 %254 }
 0x297   :  { %v257_v21 = vmul.f32 %v255_v20, %v252_v19 }
 0x299   :  { %v259_v23 = vadd.f32 %v258_v22, %v257_v21 }
 0x29b   :  { %261 = vrot.lane.b32.xlu2 %v259_v23, %s852_s4 }
 0x2f5   :  { %v262_v29 = vpop.permute.xlu2 %261 }
 0x2f6   :  { %768 = vmatmul.msk.f32.vlgmr.msrb.gmra.mxu3 %vm191_vm6, %v262_v29 }
 0x2f7   :  { %537 = vmatpush.msrb.mxu3 %v966_v24 }
 0x2f9   :  { %538 = vmatpush.msrb.mxu3 %v973_v25 }
 0x2fb   :  { %539 = vmatpush.msrb.mxu3 %v978_v26 }
 0x2fd   :  { %540 = vmatpush.msrb.mxu3 %v987_v27 }
 0x379   :  { %v282_v30 = vpop.f32.mrf.mxu3 }
 0x37a   :  { %v305_v31 = vadd.f32 %v282_v30, %v1025_v59  ;;  %v285_v34 = vadd.f32 %v282_v30, %v171_v33 }
 0x37c   :  { %307 = vrot.lane.b32.xlu2 %v305_v31, %s850_s2  ;;  %v769_v35 = vmul.f32 -1.442695, %v285_v34  ;;  %v176_v34 = vpop.f32.mrf.mxu1 }
 0x37e   :  { %808 = vpow2.f32 %v769_v35  ;;  %v177_v35 = vadd.f32 %v176_v34, %v1020_v56 }
 0x384   :  { %v809_v36 = vpop.eup %808 }
 0x385   :  { %v289_v37 = vadd.f32 1.0, %v809_v36 }
 0x387   :  { %810 = vrcp.f32 %v289_v37  ;;  %v301_v43 = vand.u32 2147483648, %v289_v37  ;;  %vm295_vm8 = vweird.f32 %v289_v37  ;;  %v299_v44 = vand.u32 2147483647, %v289_v37 }
 0x389   :  { %v302_v46 = vor.u32 1.1754944e-38, %v301_v43  ;;  %vm300_vm10 = vcmp.eq.f32.partialorder %v299_v44, 8.507059e+37 }
 0x38d   :  { %v811_v38 = vpop.eup %810 }
 0x38e   :  { %v291_v39 = vmul.f32 %v811_v38, %v289_v37  ;;  %vm296_vm7 = vweird.f32 %v811_v38 }
 0x38f   :  { %vm297_vm9 = vmor %vm295_vm8, %vm296_vm7 }
 0x390   :  { %v292_v40 = vsub.f32 1.0, %v291_v39 }
 0x392   :  { %v293_v41 = vmul.f32 %v811_v38, %v292_v40 }
 0x394   :  { %v294_v42 = vadd.f32 %v811_v38, %v293_v41 }
 0x396   :  { %v298_v45 = vsel %vm297_vm9, %v811_v38, %v294_v42 }
 0x397   :  { %v303_v48 = vsel %vm300_vm10, %v302_v46, %v298_v45 }
 0x398   :  { %v317_v53 = vsub.f32 1.0, %v303_v48  ;;  %v323_v55 = vmul.f32 %v303_v48, %v259_v23 }
 0x3d6   :  { %v308_v47 = vpop.permute.xlu2 %307 }
 0x3d7   :  { %v310_v49 = vmul.f32 %v308_v47, %v303_v48 }
 0x3d9   :  { %312 = vrot.lane.b32.xlu0 %v310_v49, %s850_s2 }
 0x44b   :  { %v313_v50 = vpop.permute.xlu0 %312 }
 0x44c   :  { %v315_v51 = vadd.f32 %v313_v50, %v171_v33 }
 0x44e   :  { %812 = vtanh.f32 %v315_v51 }
 0x454   :  { %v813_v52 = vpop.eup %812 }
 0x455   :  { %319 = vrot.lane.b32.xlu1 %v813_v52, %s852_s4 }
 0x4c7   :  { %v320_v54 = vpop.permute.xlu1 %319 }
 0x4c8   :  { %v322_v57 = vmul.f32 %v320_v54, %v317_v53 }
 0x4ca   :  { %v324_v60 = vadd.f32 %v323_v55, %v322_v57 }
 0x4cc   :  { %326 = vrot.lane.b32.xlu2 %v324_v60, %s852_s4 }
 0x526   :  { %v327_v61 = vpop.permute.xlu2 %326 }
 0x527   :  { %770 = vmatmul.msk.f32.vlgmr.msra.gmra.mxu2 %vm191_vm6, %v327_v61 }
 0x528   :  { %602 = vmatpush.msra.mxu2 %v966_v24 }
 0x52a   :  { %603 = vmatpush.msra.mxu2 %v973_v25 }
 0x52c   :  { %604 = vmatpush.msra.mxu2 %v978_v26 }
 0x52e   :  { %605 = vmatpush.msra.mxu2 %v987_v27 }
 0x5aa   :  { %v347_v62 = vpop.f32.mrf.mxu2 }
 0x5ab   :  { %v370_v63 = vadd.f32 %v347_v62, %v1025_v59  ;;  %v350_v2 = vadd.f32 %v347_v62, %v174_v1  ;;  %v179_v62 = vpop.f32.mrf.mxu1 }
 0x5ad   :  { %372 = vrot.lane.b32.xlu0 %v370_v63, %s850_s2  ;;  %v771_v3 = vmul.f32 -1.442695, %v350_v2  ;;  %v180_v63 = vadd.f32 %v179_v62, %v1020_v56 }
 0x5af   :  { %814 = vpow2.f32 %v771_v3 }
 0x5b5   :  { %v815_v4 = vpop.eup %814 }
 0x5b6   :  { %v354_v5 = vadd.f32 1.0, %v815_v4 }
 0x5b8   :  { %816 = vrcp.f32 %v354_v5  ;;  %v366_v11 = vand.u32 2147483648, %v354_v5  ;;  %vm360_vm12 = vweird.f32 %v354_v5  ;;  %v364_v12 = vand.u32 2147483647, %v354_v5 }
 0x5ba   :  { %v367_v14 = vor.u32 1.1754944e-38, %v366_v11  ;;  %vm365_vm14 = vcmp.eq.f32.partialorder %v364_v12, 8.507059e+37 }
 0x5be   :  { %v817_v6 = vpop.eup %816 }
 0x5bf   :  { %v356_v7 = vmul.f32 %v817_v6, %v354_v5  ;;  %vm361_vm11 = vweird.f32 %v817_v6 }
 0x5c0   :  { %vm362_vm13 = vmor %vm360_vm12, %vm361_vm11 }
 0x5c1   :  { %v357_v8 = vsub.f32 1.0, %v356_v7 }
 0x5c3   :  { %v358_v9 = vmul.f32 %v817_v6, %v357_v8 }
 0x5c5   :  { %v359_v10 = vadd.f32 %v817_v6, %v358_v9 }
 0x5c7   :  { %v363_v13 = vsel %vm362_vm13, %v817_v6, %v359_v10 }
 0x5c8   :  { %v368_v16 = vsel %vm365_vm14, %v367_v14, %v363_v13 }
 0x5c9   :  { %v382_v21 = vsub.f32 1.0, %v368_v16  ;;  %v388_v23 = vmul.f32 %v368_v16, %v324_v60 }
 0x61f   :  { %v373_v15 = vpop.permute.xlu0 %372 }
 0x620   :  { %v375_v17 = vmul.f32 %v373_v15, %v368_v16 }
 0x622   :  { %377 = vrot.lane.b32.xlu1 %v375_v17, %s850_s2 }
 0x694   :  { %v378_v18 = vpop.permute.xlu1 %377 }
 0x695   :  { %v380_v19 = vadd.f32 %v378_v18, %v174_v1 }
 0x697   :  { %818 = vtanh.f32 %v380_v19 }
 0x69d   :  { %v819_v20 = vpop.eup %818 }
 0x69e   :  { %384 = vrot.lane.b32.xlu2 %v819_v20, %s852_s4 }
 0x6f8   :  { %v385_v22 = vpop.permute.xlu2 %384 }
 0x6f9   :  { %v387_v29 = vmul.f32 %v385_v22, %v382_v21 }
 0x6fb   :  { %v389_v30 = vadd.f32 %v388_v23, %v387_v29 }
 0x6fd   :  { %391 = vrot.lane.b32.xlu0 %v389_v30, %s852_s4 }
 0x76f   :  { %v392_v31 = vpop.permute.xlu0 %391 }
 0x770   :  { %772 = vmatmul.msk.f32.vlgmr.msra.gmra.mxu3 %vm191_vm6, %v392_v31 }
 0x771   :  { %667 = vmatpush.msra.mxu3 %v966_v24 }
 0x773   :  { %668 = vmatpush.msra.mxu3 %v973_v25 }
 0x775   :  { %669 = vmatpush.msra.mxu3 %v978_v26 }
 0x777   :  { %670 = vmatpush.msra.mxu3 %v987_v27 }
 0x7f3   :  { %v412_v32 = vpop.f32.mrf.mxu3 }
 0x7f4   :  { %v435_v33 = vadd.f32 %v412_v32, %v1025_v59  ;;  %v415_v36 = vadd.f32 %v412_v32, %v177_v35  ;;  %v182_v32 = vpop.f32.mrf.mxu1 }
 0x7f6   :  { %437 = vrot.lane.b32.xlu1 %v435_v33, %s850_s2  ;;  %v773_v37 = vmul.f32 -1.442695, %v415_v36  ;;  %v183_v33 = vadd.f32 %v182_v32, %v1020_v56 }
 0x7f8   :  { %820 = vpow2.f32 %v773_v37 }
 0x7fe   :  { %v821_v38 = vpop.eup %820 }
 0x7ff   :  { %v419_v39 = vadd.f32 1.0, %v821_v38 }
 0x801   :  { %822 = vrcp.f32 %v419_v39  ;;  %v431_v27 = vand.u32 2147483648, %v419_v39  ;;  %vm425_vm0 = vweird.f32 %v419_v39  ;;  %v429_v42 = vand.u32 2147483647, %v419_v39 }
 0x803   :  { %v432_v44 = vor.u32 1.1754944e-38, %v431_v27  ;;  %vm430_vm2 = vcmp.eq.f32.partialorder %v429_v42, 8.507059e+37 }
 0x807   :  { %v823_v24 = vpop.eup %822 }
 0x808   :  { %v421_v25 = vmul.f32 %v823_v24, %v419_v39  ;;  %vm426_vm15 = vweird.f32 %v823_v24 }
 0x809   :  { %vm427_vm1 = vmor %vm425_vm0, %vm426_vm15 }
 0x80a   :  { %v422_v40 = vsub.f32 1.0, %v421_v25 }
 0x80c   :  { %v423_v26 = vmul.f32 %v823_v24, %v422_v40 }
 0x80e   :  { %v424_v41 = vadd.f32 %v823_v24, %v423_v26 }
 0x810   :  { %v428_v43 = vsel %vm427_vm1, %v823_v24, %v424_v41 }
 0x811   :  { %v433_v46 = vsel %vm430_vm2, %v432_v44, %v428_v43 }
 0x812   :  { %v447_v51 = vsub.f32 1.0, %v433_v46  ;;  %v453_v53 = vmul.f32 %v433_v46, %v389_v30 }
 0x868   :  { %v438_v45 = vpop.permute.xlu1 %437 }
 0x869   :  { %v440_v47 = vmul.f32 %v438_v45, %v433_v46 }
 0x86b   :  { %442 = vrot.lane.b32.xlu2 %v440_v47, %s850_s2 }
 0x8c5   :  { %v443_v48 = vpop.permute.xlu2 %442 }
 0x8c6   :  { %v445_v49 = vadd.f32 %v443_v48, %v177_v35 }
 0x8c8   :  { %824 = vtanh.f32 %v445_v49 }
 0x8ce   :  { %v825_v50 = vpop.eup %824 }
 0x8cf   :  { %449 = vrot.lane.b32.xlu0 %v825_v50, %s852_s4 }
 0x941   :  { %v450_v52 = vpop.permute.xlu0 %449 }
 0x942   :  { %v452_v54 = vmul.f32 %v450_v52, %v447_v51 }
 0x944   :  { %v454_v55 = vadd.f32 %v453_v53, %v452_v54 }
 0x946   :  { %456 = vrot.lane.b32.xlu1 %v454_v55, %s852_s4 }
 0x9b8   :  { %v457_v57 = vpop.permute.xlu1 %456 }
 0x9b9   :  { %774 = vmatmul.msk.f32.vlgmr.msrb.gmra.mxu2 %vm191_vm6, %v457_v57 }
 0xa3c   :  { %v477_v60 = vpop.f32.mrf.mxu2 }
 0xa3d   :  { %v500_v61 = vadd.f32 %v477_v60, %v1025_v59  ;;  %v480_v0 = vadd.f32 %v477_v60, %v180_v63  ;;  %v185_v60 = vpop.f32.mrf.mxu1 }
 0xa3f   :  { %502 = vrot.lane.b32.xlu2 %v500_v61, %s850_s2  ;;  %v775_v1 = vmul.f32 -1.442695, %v480_v0  ;;  %v186_v61 = vadd.f32 %v185_v60, %v1020_v56 }
 0xa41   :  { %826 = vpow2.f32 %v775_v1 }
 0xa47   :  { %v827_v2 = vpop.eup %826 }
 0xa48   :  { %v484_v3 = vadd.f32 1.0, %v827_v2 }
 0xa4a   :  { %828 = vrcp.f32 %v484_v3  ;;  %v496_v9 = vand.u32 2147483648, %v484_v3  ;;  %vm490_vm4 = vweird.f32 %v484_v3  ;;  %v494_v10 = vand.u32 2147483647, %v484_v3 }
 0xa4c   :  { %v497_v12 = vor.u32 1.1754944e-38, %v496_v9  ;;  %vm495_vm7 = vcmp.eq.f32.partialorder %v494_v10, 8.507059e+37 }
 0xa50   :  { %v829_v4 = vpop.eup %828 }
 0xa51   :  { %v486_v5 = vmul.f32 %v829_v4, %v484_v3  ;;  %vm491_vm3 = vweird.f32 %v829_v4 }
 0xa52   :  { %vm492_vm5 = vmor %vm490_vm4, %vm491_vm3  ;;  %vm745_vm4 = vcmask 7168  }
 0xa53   :  { %v487_v6 = vsub.f32 1.0, %v486_v5 }
 0xa55   :  { %v488_v7 = vmul.f32 %v829_v4, %v487_v6 }
 0xa57   :  { %v489_v8 = vadd.f32 %v829_v4, %v488_v7 }
 0xa59   :  { %v493_v11 = vsel %vm492_vm5, %v829_v4, %v489_v8 }
 0xa5a   :  { %v498_v14 = vsel %vm495_vm7, %v497_v12, %v493_v11 }
 0xa5b   :  { %v512_v19 = vsub.f32 1.0, %v498_v14  ;;  %v518_v21 = vmul.f32 %v498_v14, %v454_v55 }
 0xa99   :  { %v503_v13 = vpop.permute.xlu2 %502 }
 0xa9a   :  { %v505_v15 = vmul.f32 %v503_v13, %v498_v14 }
 0xa9c   :  { %507 = vrot.lane.b32.xlu0 %v505_v15, %s850_s2 }
 0xb0e   :  { %v508_v16 = vpop.permute.xlu0 %507 }
 0xb0f   :  { %v510_v17 = vadd.f32 %v508_v16, %v180_v63 }
 0xb11   :  { %830 = vtanh.f32 %v510_v17 }
 0xb17   :  { %v831_v18 = vpop.eup %830 }
 0xb18   :  { %514 = vrot.lane.b32.xlu1 %v831_v18, %s852_s4 }
 0xb8a   :  { %v515_v20 = vpop.permute.xlu1 %514 }
 0xb8b   :  { %v517_v22 = vmul.f32 %v515_v20, %v512_v19 }
 0xb8d   :  { %v519_v23 = vadd.f32 %v518_v21, %v517_v22 }
 0xb8f   :  { %521 = vrot.lane.b32.xlu2 %v519_v23, %s852_s4 }
 0xbe9   :  { %v522_v29 = vpop.permute.xlu2 %521 }
 0xbea   :  { %776 = vmatmul.msk.f32.vlgmr.msrb.gmra.mxu3 %vm191_vm6, %v522_v29 }
 0xc6d   :  { %v542_v30 = vpop.f32.mrf.mxu3 }
 0xc6e   :  { %v565_v31 = vadd.f32 %v542_v30, %v1025_v59  ;;  %v545_v34 = vadd.f32 %v542_v30, %v183_v33 }
 0xc70   :  { %567 = vrot.lane.b32.xlu0 %v565_v31, %s850_s2  ;;  %v777_v35 = vmul.f32 -1.442695, %v545_v34 }
 0xc72   :  { %832 = vpow2.f32 %v777_v35 }
 0xc78   :  { %v833_v36 = vpop.eup %832 }
 0xc79   :  { %v549_v37 = vadd.f32 1.0, %v833_v36 }
 0xc7b   :  { %834 = vrcp.f32 %v549_v37  ;;  %v561_v26 = vand.u32 2147483648, %v549_v37  ;;  %vm555_vm9 = vweird.f32 %v549_v37  ;;  %v559_v41 = vand.u32 2147483647, %v549_v37 }
 0xc7d   :  { %v562_v42 = vor.u32 1.1754944e-38, %v561_v26  ;;  %vm560_vm11 = vcmp.eq.f32.partialorder %v559_v41, 8.507059e+37 }
 0xc81   :  { %v835_v38 = vpop.eup %834 }
 0xc82   :  { %v551_v39 = vmul.f32 %v835_v38, %v549_v37  ;;  %vm556_vm8 = vweird.f32 %v835_v38 }
 0xc83   :  { %vm557_vm10 = vmor %vm555_vm9, %vm556_vm8 }
 0xc84   :  { %v552_v24 = vsub.f32 1.0, %v551_v39 }
 0xc86   :  { %v553_v25 = vmul.f32 %v835_v38, %v552_v24 }
 0xc88   :  { %v554_v40 = vadd.f32 %v835_v38, %v553_v25 }
 0xc8a   :  { %v558_v27 = vsel %vm557_vm10, %v835_v38, %v554_v40 }
 0xc8b   :  { %v563_v44 = vsel %vm560_vm11, %v562_v42, %v558_v27 }
 0xc8c   :  { %v577_v49 = vsub.f32 1.0, %v563_v44  ;;  %v583_v51 = vmul.f32 %v563_v44, %v519_v23 }
 0xce2   :  { %v568_v43 = vpop.permute.xlu0 %567 }
 0xce3   :  { %v570_v45 = vmul.f32 %v568_v43, %v563_v44  ;;  %v718_v43 = vld [vmem:[%s1116_s3 + $0x18] sm:$0xff]  ;;  %v717_v44 = vld [vmem:[%s1116_s3 + $0x10] sm:$0xff] }
 0xce4   :  { %737 = vmatpush.msrb.mxu2 %v718_v43 }
 0xce5   :  { %572 = vrot.lane.b32.xlu1 %v570_v45, %s850_s2  ;;  %v716_v45 = vld [vmem:[%s1116_s3 + $0x8] sm:$0xff] }
 0xce6   :  { %738 = vmatpush.msrb.mxu2 %v717_v44 }
 0xce8   :  { %739 = vmatpush.msrb.mxu2 %v716_v45 }
 0xd57   :  { %v573_v46 = vpop.permute.xlu1 %572 }
 0xd58   :  { %v575_v47 = vadd.f32 %v573_v46, %v183_v33 }
 0xd5a   :  { %836 = vtanh.f32 %v575_v47 }
 0xd60   :  { %v837_v48 = vpop.eup %836 }
 0xd61   :  { %579 = vrot.lane.b32.xlu2 %v837_v48, %s852_s4 }
 0xdbb   :  { %v580_v50 = vpop.permute.xlu2 %579 }
 0xdbc   :  { %v582_v52 = vmul.f32 %v580_v50, %v577_v49 }
 0xdbe   :  { %v584_v53 = vadd.f32 %v583_v51, %v582_v52  ;;  %v719_v52 = vperm.slane %v992_v28, 3 }
 0xdc0   :  { %586 = vrot.lane.b32.xlu0 %v584_v53, %s852_s4 }
 0xe32   :  { %v587_v54 = vpop.permute.xlu0 %586 }
 0xe33   :  { %778 = vmatmul.msk.f32.vlgmr.msra.gmra.mxu2 %vm191_vm6, %v587_v54 }
 0xeb6   :  { %v607_v55 = vpop.f32.mrf.mxu2 }
 0xeb7   :  { %v630_v57 = vadd.f32 %v607_v55, %v1025_v59  ;;  %v610_v62 = vadd.f32 %v607_v55, %v186_v61 }
 0xeb9   :  { %632 = vrot.lane.b32.xlu1 %v630_v57, %s850_s2  ;;  %v779_v63 = vmul.f32 -1.442695, %v610_v62 }
 0xebb   :  { %838 = vpow2.f32 %v779_v63 }
 0xec1   :  { %v839_v0 = vpop.eup %838 }
 0xec2   :  { %v614_v1 = vadd.f32 1.0, %v839_v0 }
 0xec4   :  { %840 = vrcp.f32 %v614_v1  ;;  %v626_v7 = vand.u32 2147483648, %v614_v1  ;;  %vm620_vm13 = vweird.f32 %v614_v1  ;;  %v624_v8 = vand.u32 2147483647, %v614_v1 }
 0xec6   :  { %v627_v10 = vor.u32 1.1754944e-38, %v626_v7  ;;  %vm625_vm15 = vcmp.eq.f32.partialorder %v624_v8, 8.507059e+37 }
 0xeca   :  { %v841_v2 = vpop.eup %840 }
 0xecb   :  { %v616_v3 = vmul.f32 %v841_v2, %v614_v1  ;;  %vm621_vm12 = vweird.f32 %v841_v2 }
 0xecc   :  { %vm622_vm14 = vmor %vm620_vm13, %vm621_vm12 }
 0xecd   :  { %v617_v4 = vsub.f32 1.0, %v616_v3 }
 0xecf   :  { %v618_v5 = vmul.f32 %v841_v2, %v617_v4 }
 0xed1   :  { %v619_v6 = vadd.f32 %v841_v2, %v618_v5 }
 0xed3   :  { %v623_v9 = vsel %vm622_vm14, %v841_v2, %v619_v6 }
 0xed4   :  { %v628_v11 = vsel %vm625_vm15, %v627_v10, %v623_v9 }
 0xed5   :  { %v642_v16 = vsub.f32 1.0, %v628_v11  ;;  %v648_v18 = vmul.f32 %v628_v11, %v584_v53 }
 0xf2b   :  { %v633_v56 = vpop.permute.xlu1 %632 }
 0xf2c   :  { %v635_v12 = vmul.f32 %v633_v56, %v628_v11 }
 0xf2e   :  { %637 = vrot.lane.b32.xlu2 %v635_v12, %s850_s2 }
 0xf88   :  { %v638_v13 = vpop.permute.xlu2 %637 }
 0xf89   :  { %v640_v14 = vadd.f32 %v638_v13, %v186_v61 }
 0xf8b   :  { %842 = vtanh.f32 %v640_v14 }
 0xf91   :  { %v843_v15 = vpop.eup %842 }
 0xf92   :  { %644 = vrot.lane.b32.xlu0 %v843_v15, %s852_s4 }
0x1004   :  { %v645_v17 = vpop.permute.xlu0 %644 }
0x1005   :  { %v647_v19 = vmul.f32 %v645_v17, %v642_v16 }
0x1007   :  { %v649_v20 = vadd.f32 %v648_v18, %v647_v19 }
0x1009   :  { %651 = vrot.lane.b32.xlu1 %v649_v20, %s852_s4 }
0x107b   :  { %v652_v21 = vpop.permute.xlu1 %651 }
0x107c   :  { %780 = vmatmul.msk.f32.vlgmr.msra.gmra.mxu3 %vm191_vm6, %v652_v21 }
0x10ff   :  { %v672_v22 = vpop.f32.mrf.mxu3 }
0x1100   :  { %v695_v23 = vadd.f32 %v672_v22, %v1025_v59  ;;  %v675_v29 = vadd.f32 %v672_v22, %v1023_v58 }
0x1102   :  { %697 = vrot.lane.b32.xlu2 %v695_v23, %s850_s2  ;;  %v781_v30 = vmul.f32 -1.442695, %v675_v29 }
0x1104   :  { %844 = vpow2.f32 %v781_v30 }
0x110a   :  { %v845_v31 = vpop.eup %844 }
0x110b   :  { %v679_v32 = vadd.f32 1.0, %v845_v31 }
0x110d   :  { %846 = vrcp.f32 %v679_v32  ;;  %v691_v38 = vand.u32 2147483648, %v679_v32  ;;  %vm685_vm1 = vweird.f32 %v679_v32  ;;  %v689_v39 = vand.u32 2147483647, %v679_v32 }
0x110f   :  { %v692_v24 = vor.u32 1.1754944e-38, %v691_v38  ;;  %vm690_vm3 = vcmp.eq.f32.partialorder %v689_v39, 8.507059e+37 }
0x1113   :  { %v847_v33 = vpop.eup %846 }
0x1114   :  { %v681_v34 = vmul.f32 %v847_v33, %v679_v32  ;;  %vm686_vm0 = vweird.f32 %v847_v33 }
0x1115   :  { %vm687_vm2 = vmor %vm685_vm1, %vm686_vm0 }
0x1116   :  { %v682_v35 = vsub.f32 1.0, %v681_v34 }
0x1118   :  { %v683_v36 = vmul.f32 %v847_v33, %v682_v35 }
0x111a   :  { %v684_v37 = vadd.f32 %v847_v33, %v683_v36 }
0x111c   :  { %v688_v59 = vsel %vm687_vm2, %v847_v33, %v684_v37 }
0x111d   :  { %v693_v40 = vsel %vm690_vm3, %v692_v24, %v688_v59 }
0x111e   :  { %v707_v46 = vsub.f32 1.0, %v693_v40  ;;  %v713_v48 = vmul.f32 %v693_v40, %v649_v20 }
0x115c   :  { %v698_v25 = vpop.permute.xlu2 %697 }
0x115d   :  { %v700_v26 = vmul.f32 %v698_v25, %v693_v40 }
0x115f   :  { %702 = vrot.lane.b32.xlu0 %v700_v26, %s850_s2 }
0x11d1   :  { %v703_v41 = vpop.permute.xlu0 %702 }
0x11d2   :  { %v705_v27 = vadd.f32 %v703_v41, %v1023_v58  ;;  %v715_v58 = vld [vmem:[%s1116_s3] sm:$0xff] }
0x11d3   :  { %740 = vmatpush.msrb.mxu2 %v715_v58 }
0x11d4   :  { %848 = vtanh.f32 %v705_v27 }
0x11da   :  { %v849_v42 = vpop.eup %848 }
0x11db   :  { %709 = vrot.lane.b32.xlu1 %v849_v42, %s852_s4 }
0x124d   :  { %v710_v47 = vpop.permute.xlu1 %709 }
0x124e   :  { %v712_v49 = vmul.f32 %v710_v47, %v707_v46 }
0x1250   :  { %v714_v50 = vadd.f32 %v713_v48, %v712_v49 }
0x1252   :  { %721 = vrot.lane.b32.xlu2 %v714_v50, %s852_s4 }
0x12ac   :  { %v722_v51 = vpop.permute.xlu2 %721 }
0x12ad   :  { %782 = vmatmul.msk.f32.vlgmr.msrb.gmra.mxu2 %vm191_vm6, %v722_v51 }
0x1330   :  { %v742_v53 = vpop.f32.mrf.mxu2 }
0x1331   :  { %v743_v54 = vadd.f32 %v742_v53, %v719_v52 }
0x1333   :  { %746 = vst.msk [vmem:[%s1117_s5] sm:$0xff] %vm745_vm4, %v743_v54 }

</bundles_post_ra>
